<compile_context>
chip_gen: v7x
topology: tpu7x:2x2x1
jax: 0.10.0
libtpu: 0.0.40
codegen_flags: <defaults>
</compile_context>

<pallas_src>
import jax
import jax.numpy as jnp
from jax import lax
from jax.experimental import pallas as pl
from jax.experimental.pallas import tpu as pltpu

BN_EPS = 1e-5
LANE = 128          # vreg lane width  -> channel padding
SUBLANE = 8         # vreg sublane width -> row (L) padding
TL_TARGET = 512     # rows per conv tile
PASS2_ROWS = 2048   # target rows per BN/ReLU tile (pure HBM-bound pass)


def _round_up(x, m):
    return ((x + m - 1) // m) * m


def _vmem_limit_bytes():
    # Generation-aware VMEM cap: ~3/4 of physical (v5e/v6e: ~96 MiB, v7x: ~48 MiB).
    try:
        cap = pltpu.get_tpu_info().vmem_capacity_bytes
    except Exception:
        cap = 64 * 1024 * 1024
    return int(cap * 3 // 4)


# ---------------------------------------------------------------------------
# Kernel 1: Conv1d as a single packed-contraction MXU matmul + BN partial stats
# ---------------------------------------------------------------------------
def _conv_stats_kernel(x_ref, w_ref, y_ref, ssum_ref, ssq_ref):
    # x_ref   : (1, TL, KCp)   bf16 per-row conv windows (K taps packed into lanes)
    # w_ref   : (KCp, TCO)     bf16 packed conv weight
    # y_ref   : (1, TL, TCO)   bf16 conv output tile
    # ssum_ref: (1, 1, 1, TCO) f32 per-tile per-channel sum
    # ssq_ref : (1, 1, 1, TCO) f32 per-tile per-channel sum of squares
    acc = jnp.dot(x_ref[0], w_ref[...], preferred_element_type=jnp.float32)  # (TL, TCO) f32
    y_ref[0] = acc.astype(y_ref.dtype)
    # Zero-padded rows/lanes contribute exactly 0 to both partials -> no validity mask needed.
    ssum_ref[0, 0] = jnp.sum(acc, axis=0, keepdims=True)
    ssq_ref[0, 0] = jnp.sum(acc * acc, axis=0, keepdims=True)


# ---------------------------------------------------------------------------
# Kernel 2: fused BatchNorm (precomputed per-channel scale/shift) + ReLU
# ---------------------------------------------------------------------------
def _bn_relu_kernel(y_ref, scale_ref, shift_ref, o_ref):
    y = y_ref[...].astype(jnp.float32)
    o_ref[...] = jnp.maximum(y * scale_ref[...] + shift_ref[...], 0.0).astype(o_ref.dtype)


@jax.jit
def conv_block_forward(x, conv_w, conv_b, bn_gamma, bn_beta):
    """x: (N, C_in, L) float32 -> (N, C_out, L_out) float32 (PyTorch NCL layout)."""
    N, C_in, L = x.shape
    C_out, c_in_w, K = conv_w.shape
    assert c_in_w == C_in
    assert bn_gamma.shape[0] == C_out and bn_beta.shape[0] == C_out  # needs in_dim == out_dim
    L_out = L - K + 1
    assert L_out >= 1

    # Padded, lane/sublane-friendly sizes.
    KC = K * C_in
    KCp = _round_up(KC, LANE)                 # packed contraction width
    Cp_out = _round_up(C_out, LANE)
    TCO = 256 if Cp_out % 256 == 0 else 128   # feed the 256x256 MXU / 2 TCs when C_out >= 256
    n_co = Cp_out // TCO
    TL = min(TL_TARGET, _round_up(L_out, SUBLANE))
    L_out_pad = _round_up(L_out, TL)
    n_lt = L_out_pad // TL

    # ---- layout glue ----------------------------------------------------------------------
    # TODO(synk): these transposes/pads/concats are separate XLA copy ops; a production kernel
    # would take channels-last input directly, and for large C_in (K*C_in >> 128) would keep a
    # resident per-batch slab with in-kernel shifts instead of packing K taps (packing is
    # byte-free only while K*C_in fits the same 128-lane padding as C_in, as it does here).
    x_nlc = jnp.transpose(x, (0, 2, 1)).astype(jnp.float32)                 # (N, L, C_in)
    x_win = jnp.concatenate([x_nlc[:, k:k + L_out, :] for k in range(K)], axis=-1)
    x_win = jnp.pad(x_win, ((0, 0), (0, L_out_pad - L_out), (0, KCp - KC)))
    x_win = x_win.astype(jnp.bfloat16)                                      # (N, L_out_pad, KCp)
    w_packed = jnp.transpose(conv_w, (2, 1, 0)).reshape(KC, C_out).astype(jnp.float32)
    w_packed = jnp.pad(w_packed, ((0, KCp - KC), (0, Cp_out - C_out))).astype(jnp.bfloat16)

    vmem_bytes = _vmem_limit_bytes()

    # ---- pass 1: conv (one MXU dot per tile) + BN partial sums -----------------------------
    flops1 = 2 * N * L_out * K * C_in * C_out
    bytes1 = (2 * x_win.size + 2 * w_packed.size
              + 2 * N * L_out_pad * Cp_out + 2 * 4 * N * n_lt * Cp_out)
    y_pad, ssum, ssq = pl.pallas_call(
        _conv_stats_kernel,
        out_shape=(
            jax.ShapeDtypeStruct((N, L_out_pad, Cp_out), jnp.bfloat16),
            jax.ShapeDtypeStruct((N, n_lt, 1, Cp_out), jnp.float32),
            jax.ShapeDtypeStruct((N, n_lt, 1, Cp_out), jnp.float32),
        ),
        grid=(N, n_lt, n_co),
        in_specs=[
            pl.BlockSpec((1, TL, KCp), lambda n, lt, co: (n, lt, 0)),
            pl.BlockSpec((KCp, TCO), lambda n, lt, co: (0, co)),
        ],
        out_specs=(
            pl.BlockSpec((1, TL, TCO), lambda n, lt, co: (n, lt, co)),
            pl.BlockSpec((1, 1, 1, TCO), lambda n, lt, co: (n, lt, 0, co)),
            pl.BlockSpec((1, 1, 1, TCO), lambda n, lt, co: (n, lt, 0, co)),
        ),
        compiler_params=pltpu.CompilerParams(
            dimension_semantics=("parallel", "parallel", "parallel"),
            vmem_limit_bytes=vmem_bytes),
        cost_estimate=pl.CostEstimate(flops=flops1, transcendentals=0,
                                      bytes_accessed=bytes1),
    )(x_win, w_packed)

    # ---- tiny JAX glue: fold global batch stats into a per-channel FMA ---------------------
    count = float(N * L_out)  # padded rows are exactly zero -> excluded by construction
    ch_sum = jnp.sum(ssum[..., :C_out], axis=(0, 1, 2))
    ch_sumsq = jnp.sum(ssq[..., :C_out], axis=(0, 1, 2))
    mean = ch_sum / count
    var = jnp.maximum(ch_sumsq / count - mean * mean, 0.0)   # biased var (training-mode BN)
    # TODO(synk): E[y^2]-mean^2 cancels for |mean| >> std; a shifted-sum / Welford merge in
    # this glue would be more robust for very long sequences.
    scale = bn_gamma.astype(jnp.float32) * lax.rsqrt(var + BN_EPS)
    # Conv bias is mathematically absorbed by training-mode BatchNorm:
    #   BN(acc + b) = (acc + b - (mean_acc + b)) * inv_std = BN(acc)
    # so conv_b never has to touch the kernels (it only matters with batch_norm=False).
    shift = bn_beta.astype(jnp.float32) - mean * scale
    scale_p = jnp.pad(scale, (0, Cp_out - C_out)).reshape(1, Cp_out)
    shift_p = jnp.pad(shift, (0, Cp_out - C_out)).reshape(1, Cp_out)

    # ---- pass 2: fused per-channel scale/shift + ReLU (pure HBM-bound) ---------------------
    R_total = N * L_out_pad
    m = R_total // TL
    rows_mult = 1
    for cand in range(m, 0, -1):                 # largest multiple of TL dividing R_total
        if cand * TL <= PASS2_ROWS and m % cand == 0:
            rows_mult = cand
            break
    TR = rows_mult * TL
    y2 = y_pad.reshape(R_total, Cp_out)          # free view: merges contiguous leading dims

    bytes2 = 2 * 2 * R_total * Cp_out + 2 * 4 * Cp_out
    out2 = pl.pallas_call(
        _bn_relu_kernel,
        out_shape=jax.ShapeDtypeStruct((R_total, Cp_out), jnp.bfloat16),
        grid=(R_total // TR,),
        in_specs=[
            pl.BlockSpec((TR, Cp_out), lambda r: (r, 0)),
            pl.BlockSpec((1, Cp_out), lambda r: (0, 0)),
            pl.BlockSpec((1, Cp_out), lambda r: (0, 0)),
        ],
        out_specs=pl.BlockSpec((TR, Cp_out), lambda r: (r, 0)),
        input_output_aliases={0: 0},             # output reuses y_pad's HBM buffer
        compiler_params=pltpu.CompilerParams(
            dimension_semantics=("parallel",), vmem_limit_bytes=vmem_bytes),
        cost_estimate=pl.CostEstimate(flops=2 * R_total * Cp_out, transcendentals=0,
                                      bytes_accessed=bytes2),
    )(y2, scale_p, shift_p)

    # Strip padding, back to PyTorch NCL layout and f32.
    out = out2.reshape(N, L_out_pad, Cp_out)[:, :L_out, :C_out]
    return jnp.transpose(out, (0, 2, 1)).astype(jnp.float32)


def reference_forward(x, conv_w, conv_b, bn_gamma, bn_beta):
    """Independent pure-JAX (all-f32) reference using lax conv."""
    y = lax.conv_general_dilated(
        x, conv_w, window_strides=(1,), padding="VALID",
        dimension_numbers=("NCH", "OIH", "NCH"))
    y = y + conv_b[None, :, None]
    mean = jnp.mean(y, axis=(0, 2), keepdims=True)
    var = jnp.mean((y - mean) ** 2, axis=(0, 2), keepdims=True)
    y = (y - mean) * lax.rsqrt(var + BN_EPS)
    y = y * bn_gamma[None, :, None] + bn_beta[None, :, None]
    return jnp.maximum(y, 0.0)


if __name__ == "__main__":
    # Small shapes: in_dim == out_dim == 8 (required by the module's BN usage),
    # batch=2, seq length=16, kernel_size=3 -> L_out=14.
    N, C_in, L, K = 2, 8, 16, 3
    C_out = C_in

    key = jax.random.PRNGKey(0)
    kx, kw, kb, kg, kbe = jax.random.split(key, 5)

    x = jax.random.normal(kx, (N, C_in, L), dtype=jnp.float32)
    conv_w = jax.random.normal(kw, (C_out, C_in, K), dtype=jnp.float32) * 0.1
    conv_b = jax.random.normal(kb, (C_out,), dtype=jnp.float32) * 0.1
    bn_gamma = 1.0 + 0.1 * jax.random.normal(kg, (C_out,), dtype=jnp.float32)
    bn_beta = 0.1 * jax.random.normal(kbe, (C_out,), dtype=jnp.float32)

    out = conv_block_forward(x, conv_w, conv_b, bn_gamma, bn_beta)
    out = jax.block_until_ready(out)

    ref = reference_forward(x, conv_w, conv_b, bn_gamma, bn_beta)
    assert out.shape == (N, C_out, L - K + 1)
    # Tolerance sized for bf16 MXU inputs and the bf16 intermediate vs the all-f32 reference.
    assert jnp.allclose(out, ref, atol=5e-2, rtol=5e-2), "mismatch vs reference"

    print("KERNEL_OK")
</pallas_src>

<mosaic_0001>
module attributes {stable_mosaic.version = 11 : i64} {
  func.func @_conv_stats_kernel(%arg0: i32, %arg1: i32, %arg2: i32, %arg3: memref<1x16x128xbf16, #tpu.memory_space<vmem>>, %arg4: memref<128x128xbf16, #tpu.memory_space<vmem>>, %arg5: memref<1x16x128xbf16, #tpu.memory_space<vmem>>, %arg6: memref<1x1x1x128xf32, #tpu.memory_space<vmem>>, %arg7: memref<1x1x1x128xf32, #tpu.memory_space<vmem>>) attributes {dimension_semantics = [#tpu.dimension_semantics<parallel>, #tpu.dimension_semantics<parallel>, #tpu.dimension_semantics<parallel>], iteration_bounds = array<i64: 2, 1, 1>, scalar_prefetch = 0 : i64, scratch_operands = 0 : i64, tpu.core_type = #tpu.core_type<tc>, window_params = [{transform_indices = @transform_0, window_bounds = array<i64: 1, 16, 128>}, {transform_indices = @transform_1, window_bounds = array<i64: 128, 128>}, {transform_indices = @transform_2, window_bounds = array<i64: 1, 16, 128>}, {transform_indices = @transform_3, window_bounds = array<i64: 1, 1, 1, 128>}, {transform_indices = @transform_4, window_bounds = array<i64: 1, 1, 1, 128>}]} {
    %c0 = arith.constant 0 : index
    %c0_0 = arith.constant 0 : index
    %c0_1 = arith.constant 0 : index
    %0 = vector.load %arg3[%c0, %c0_0, %c0_1] : memref<1x16x128xbf16, #tpu.memory_space<vmem>>, vector<1x16x128xbf16>
    %1 = vector.shape_cast %0 : vector<1x16x128xbf16> to vector<16x128xbf16>
    %c0_2 = arith.constant 0 : index
    %c0_3 = arith.constant 0 : index
    %2 = vector.load %arg4[%c0_2, %c0_3] : memref<128x128xbf16, #tpu.memory_space<vmem>>, vector<128x128xbf16>
    %cst = arith.constant dense<0.000000e+00> : vector<16x128xf32>
    %3 = tpu.matmul %1, %2, %cst {dimension_numbers = #tpu.dot_dimension_numbers<[1], [0], [0], [1], [0, 0, 1, 1], [], []>} : vector<16x128xbf16>, vector<128x128xbf16>, vector<16x128xf32> -> vector<16x128xf32>
    %4 = arith.truncf %3 : vector<16x128xf32> to vector<16x128xbf16>
    %c0_4 = arith.constant 0 : index
    %c0_5 = arith.constant 0 : index
    %c0_6 = arith.constant 0 : index
    %5 = vector.load %arg5[%c0_4, %c0_5, %c0_6] : memref<1x16x128xbf16, #tpu.memory_space<vmem>>, vector<1x16x128xbf16>
    %6 = vector.shape_cast %5 : vector<1x16x128xbf16> to vector<16x128xbf16>
    %7 = vector.shape_cast %4 : vector<16x128xbf16> to vector<1x16x128xbf16>
    tpu.vector_store %arg5[%c0_4, %c0_5, %c0_6], %7 {strides = array<i32>} : memref<1x16x128xbf16, #tpu.memory_space<vmem>>, vector<1x16x128xbf16>,
    %cst_7 = arith.constant dense<0.000000e+00> : vector<128xf32>
    %8 = vector.multi_reduction <add>, %3, %cst_7 [0] : vector<16x128xf32> to vector<128xf32>
    %9 = vector.shape_cast %8 : vector<128xf32> to vector<1x128xf32>
    %c0_8 = arith.constant 0 : index
    %c0_9 = arith.constant 0 : index
    %c0_10 = arith.constant 0 : index
    %c0_11 = arith.constant 0 : index
    %10 = vector.load %arg6[%c0_8, %c0_9, %c0_10, %c0_11] : memref<1x1x1x128xf32, #tpu.memory_space<vmem>>, vector<1x1x1x128xf32>
    %11 = vector.shape_cast %10 : vector<1x1x1x128xf32> to vector<1x128xf32>
    %12 = vector.shape_cast %9 : vector<1x128xf32> to vector<1x1x1x128xf32>
    tpu.vector_store %arg6[%c0_8, %c0_9, %c0_10, %c0_11], %12 {strides = array<i32>} : memref<1x1x1x128xf32, #tpu.memory_space<vmem>>, vector<1x1x1x128xf32>,
    %13 = arith.mulf %3, %3 : vector<16x128xf32>
    %cst_12 = arith.constant dense<0.000000e+00> : vector<128xf32>
    %14 = vector.multi_reduction <add>, %13, %cst_12 [0] : vector<16x128xf32> to vector<128xf32>
    %15 = vector.shape_cast %14 : vector<128xf32> to vector<1x128xf32>
    %c0_13 = arith.constant 0 : index
    %c0_14 = arith.constant 0 : index
    %c0_15 = arith.constant 0 : index
    %c0_16 = arith.constant 0 : index
    %16 = vector.load %arg7[%c0_13, %c0_14, %c0_15, %c0_16] : memref<1x1x1x128xf32, #tpu.memory_space<vmem>>, vector<1x1x1x128xf32>
    %17 = vector.shape_cast %16 : vector<1x1x1x128xf32> to vector<1x128xf32>
    %18 = vector.shape_cast %15 : vector<1x128xf32> to vector<1x1x1x128xf32>
    tpu.vector_store %arg7[%c0_13, %c0_14, %c0_15, %c0_16], %18 {strides = array<i32>} : memref<1x1x1x128xf32, #tpu.memory_space<vmem>>, vector<1x1x1x128xf32>,
    return
  }
  func.func @transform_0(%arg0: i32, %arg1: i32, %arg2: i32) -> (i32, i32, i32) {
    %c0_i32 = arith.constant 0 : i32
    %c0_i32_0 = arith.constant 0 : i32
    return %arg0, %arg1, %c0_i32 : i32, i32, i32
  }
  func.func @transform_1(%arg0: i32, %arg1: i32, %arg2: i32) -> (i32, i32) {
    %c0_i32 = arith.constant 0 : i32
    %c0_i32_0 = arith.constant 0 : i32
    return %c0_i32, %arg2 : i32, i32
  }
  func.func @transform_2(%arg0: i32, %arg1: i32, %arg2: i32) -> (i32, i32, i32) {
    %c0_i32 = arith.constant 0 : i32
    return %arg0, %arg1, %arg2 : i32, i32, i32
  }
  func.func @transform_3(%arg0: i32, %arg1: i32, %arg2: i32) -> (i32, i32, i32, i32) {
    %c0_i32 = arith.constant 0 : i32
    %c0_i32_0 = arith.constant 0 : i32
    return %arg0, %arg1, %c0_i32, %arg2 : i32, i32, i32, i32
  }
  func.func @transform_4(%arg0: i32, %arg1: i32, %arg2: i32) -> (i32, i32, i32, i32) {
    %c0_i32 = arith.constant 0 : i32
    %c0_i32_0 = arith.constant 0 : i32
    return %arg0, %arg1, %c0_i32, %arg2 : i32, i32, i32, i32
  }
}

module attributes {stable_mosaic.version = 11 : i64} {
  func.func @_bn_relu_kernel(%arg0: i32, %arg1: memref<32x128xbf16, #tpu.memory_space<vmem>>, %arg2: memref<1x128xf32, #tpu.memory_space<vmem>>, %arg3: memref<1x128xf32, #tpu.memory_space<vmem>>, %arg4: memref<32x128xbf16, #tpu.memory_space<vmem>>) attributes {dimension_semantics = [#tpu.dimension_semantics<parallel>], iteration_bounds = array<i64: 1>, scalar_prefetch = 0 : i64, scratch_operands = 0 : i64, tpu.core_type = #tpu.core_type<tc>, window_params = [{transform_indices = @transform_0, window_bounds = array<i64: 32, 128>}, {pipeline_mode = #tpu.pipeline_mode<synchronous>, transform_indices = @transform_1, window_bounds = array<i64: 1, 128>}, {pipeline_mode = #tpu.pipeline_mode<synchronous>, transform_indices = @transform_2, window_bounds = array<i64: 1, 128>}, {transform_indices = @transform_3, window_bounds = array<i64: 32, 128>}]} {
    %c0 = arith.constant 0 : index
    %c0_0 = arith.constant 0 : index
    %0 = vector.load %arg1[%c0, %c0_0] : memref<32x128xbf16, #tpu.memory_space<vmem>>, vector<32x128xbf16>
    %1 = arith.extf %0 : vector<32x128xbf16> to vector<32x128xf32>
    %c0_1 = arith.constant 0 : index
    %c0_2 = arith.constant 0 : index
    %2 = vector.load %arg2[%c0_1, %c0_2] : memref<1x128xf32, #tpu.memory_space<vmem>>, vector<1x128xf32>
    %3 = vector.broadcast %2 : vector<1x128xf32> to vector<32x128xf32>
    %4 = arith.mulf %1, %3 : vector<32x128xf32>
    %c0_3 = arith.constant 0 : index
    %c0_4 = arith.constant 0 : index
    %5 = vector.load %arg3[%c0_3, %c0_4] : memref<1x128xf32, #tpu.memory_space<vmem>>, vector<1x128xf32>
    %6 = vector.broadcast %5 : vector<1x128xf32> to vector<32x128xf32>
    %7 = arith.addf %4, %6 : vector<32x128xf32>
    %cst = arith.constant 0.000000e+00 : f32
    %8 = vector.broadcast %cst : f32 to vector<32x128xf32>
    %9 = arith.maximumf %7, %8 : vector<32x128xf32>
    %10 = arith.truncf %9 : vector<32x128xf32> to vector<32x128xbf16>
    %c0_5 = arith.constant 0 : index
    %c0_6 = arith.constant 0 : index
    %11 = vector.load %arg4[%c0_5, %c0_6] : memref<32x128xbf16, #tpu.memory_space<vmem>>, vector<32x128xbf16>
    tpu.vector_store %arg4[%c0_5, %c0_6], %10 {strides = array<i32>} : memref<32x128xbf16, #tpu.memory_space<vmem>>, vector<32x128xbf16>,
    return
  }
  func.func @transform_0(%arg0: i32) -> (i32, i32) {
    %c0_i32 = arith.constant 0 : i32
    %c0_i32_0 = arith.constant 0 : i32
    return %arg0, %c0_i32 : i32, i32
  }
  func.func @transform_1(%arg0: i32) -> (i32, i32) {
    %c0_i32 = arith.constant 0 : i32
    %c0_i32_0 = arith.constant 0 : i32
    %c0_i32_1 = arith.constant 0 : i32
    return %c0_i32, %c0_i32_0 : i32, i32
  }
  func.func @transform_2(%arg0: i32) -> (i32, i32) {
    %c0_i32 = arith.constant 0 : i32
    %c0_i32_0 = arith.constant 0 : i32
    %c0_i32_1 = arith.constant 0 : i32
    return %c0_i32, %c0_i32_0 : i32, i32
  }
  func.func @transform_3(%arg0: i32) -> (i32, i32) {
    %c0_i32 = arith.constant 0 : i32
    %c0_i32_0 = arith.constant 0 : i32
    return %arg0, %c0_i32 : i32, i32
  }
}

</mosaic_0001>

<bundles_post_ra>
// kernel: conv_block_forward.3
= control target key start
LH: loop header
LB: loop body
LE: loop exit
PB: predicated region body
PF: predicated region fallthrough
CT: control target
= control target key end

     0   :  { %s140_s0 = inlined_call_operand.vmem [shape: bf16[32,128], index: 0, kind: input, shape index: {}, may-alias: {0,3}]   ;;  %s141_s1 = inlined_call_operand.vmem [shape: f32[1,128], index: 1, kind: input, shape index: {}]   ;;  %s142_s2 = inlined_call_operand.vmem [shape: f32[1,128], index: 2, kind: input, shape index: {}]   ;;  %s143_s3 = inlined_call_operand.vmem [shape: bf16[32,128], index: 3, kind: output, shape index: {}, may-alias: {0,3}]  }
   0x1   :  { %v83_v0 = vld [vmem:[%s140_s0] sm:$0xff]   ;;  %v100_v4 = vld [vmem:[%s140_s0 + $0x8] sm:$0xff]  }
   0x2   :  { %v72_v1 = vld [vmem:[%s141_s1] ss:$0 sm:$0xff]  ;;  %v84_v2 = vunpack.c.l.bf16 %v83_v0  ;;  %v85_v3 = vunpack.c.h.bf16 %v83_v0  ;;  %v88_v6 = vunpack.c.l.bf16 %v100_v4  ;;  %v89_v7 = vunpack.c.h.bf16 %v100_v4 }
   0x3   :  { %v73_v5 = vld [vmem:[%s142_s2] ss:$0 sm:$0xff] }
   0x4   :  { %v29_v8 = vmul.f32 %v84_v2, %v72_v1  ;;  %v30_v9 = vmul.f32 %v85_v3, %v72_v1  ;;  %v31_v10 = vmul.f32 %v88_v6, %v72_v1  ;;  %v32_v11 = vmul.f32 %v89_v7, %v72_v1 }
   0x6   :  { %v40_v12 = vadd.f32 %v73_v5, %v29_v8  ;;  %v41_v13 = vadd.f32 %v73_v5, %v30_v9  ;;  %v42_v14 = vadd.f32 %v73_v5, %v31_v10  ;;  %v43_v15 = vadd.f32 %v73_v5, %v32_v11 }
   0x8   :  { %v44_v16 = vmax.f32 %v40_v12, 0.0  ;;  %v45_v17 = vmax.f32 %v41_v13, 0.0  ;;  %v46_v18 = vmax.f32 %v42_v14, 0.0  ;;  %v47_v19 = vmax.f32 %v43_v15, 0.0 }
   0xa   :  { %v93_v20 = vpack.c.bf16 %v45_v17, %v44_v16  ;;  %v98_v21 = vpack.c.bf16 %v47_v19, %v46_v18 }
   0xc   :  { %94 = vst [vmem:[%s143_s3] sm:$0xff] %v93_v20   ;;  %101 = vst [vmem:[%s143_s3 + $0x8] sm:$0xff] %v98_v21  }

// kernel: conv_block_forward.2
= control target key start
LH: loop header
LB: loop body
LE: loop exit
PB: predicated region body
PF: predicated region fallthrough
CT: control target
= control target key end

     0   :  { %s812_s15 = smov 0   ;;  %s814_s16 = smov 0   ;;  %s880_s0 = inlined_call_operand.vmem [shape: bf16[2,16,128], index: 0, kind: input, shape index: {}]   ;;  %s881_s1 = inlined_call_operand.vmem [shape: bf16[128,128], index: 1, kind: input, shape index: {}]   ;;  %s882_s2 = inlined_call_operand.vmem [shape: bf16[2,16,128], index: 2, kind: output, shape index: {0}]   ;;  %s883_s3 = inlined_call_operand.vmem [shape: f32[2,1,1,128], index: 3, kind: output, shape index: {1}]   ;;  %s884_s4 = inlined_call_operand.vmem [shape: f32[2,1,1,128], index: 4, kind: output, shape index: {2}]  }
   0x1   :  { %s816_s17 = smov 0  }
   0x2 LB: > { %s34_s18 = sadd.s32 1, %s779_s16  ;;  %p670_p0 = scmp.ge.s32.totalorder %s783_s17, 1  ;;  %s783_s17 = sphi %s816_s17, %s15_s17   ;;  %s779_s16 = sphi %s814_s16, %s886_s16   ;;  %s775_s15 = sphi %s812_s15, %s885_s15  }
   0x3   : > { %p36_p1 = scmp.ge.s32.totalorder %s34_s18, 2  ;;  %p214_p2 = scmp.lt.s32.totalorder %s783_s17, 3 }
   0x5   : > { %s888_s18 = smov (%p36_p1, %s34_s18), 0  ;;  %p215_p3 = pnand %p670_p0, %p214_p2 }
   0x6   : > { %v752_v0 = vld [vmem:[%s881_s1] sm:$0xff] (!%p215_p3)   ;;  %v785_v1 = vmov (!%p215_p3), 0.0   ;;  %v753_v2 = vld [vmem:[%s881_s1 + $0x8] sm:$0xff] (!%p215_p3)   ;;  %vm786_vm0 = vmmov (!%p215_p3), 0   ;;  %p274_p4 = scmp.lt.s32.totalorder (!%p215_p3), %s775_s15, 1  ;;  %v754_v3 = vld [vmem:[%s881_s1 + $0x10] sm:$0xff] (!%p215_p3)  }
   0x7   : > { %218 = sbr.rel (%p215_p3) target bundleno = 270 (0x10e), region = 28  ;;  %706 = vmatprep.subr.bf16.mxu0 (!%p215_p3), %v785_v1  ;;  %722 = vmatprep.mubr.msk.bf16.mxu0 (!%p215_p3), %vm786_vm0, %v785_v1  ;;  %v755_v4 = vld [vmem:[%s881_s1 + $0x18] sm:$0xff] (!%p215_p3)   ;;  %v756_v5 = vld [vmem:[%s881_s1 + $0x20] sm:$0xff] (!%p215_p3)   ;;  %v757_v6 = vld [vmem:[%s881_s1 + $0x28] sm:$0xff] (!%p215_p3)  }
   0x8   : > { %707 = vmatpush3.bf16.msra.mxu0 (!%p215_p3), %v752_v0  ;;  %v758_v7 = vld [vmem:[%s881_s1 + $0x30] sm:$0xff] (!%p215_p3)   ;;  %v759_v8 = vld [vmem:[%s881_s1 + $0x38] sm:$0xff] (!%p215_p3)  }
   0x9   : > { %708 = vmatprep.subr.bf16.mxu0 (!%p215_p3), %v785_v1 }
   0xc   : > { %709 = vmatpush3.bf16.msra.mxu0 (!%p215_p3), %v753_v2 }
   0xd   : > { %710 = vmatprep.subr.bf16.mxu0 (!%p215_p3), %v785_v1 }
   0xe   : > { %s890_s15 = smov (!%p274_p4, %s775_s15), 1 }
   0xf   : > { %s688_s25 = sshll.u32 %s890_s15, 3  ;;  %s308_s22 = scalar_lea.vmem %s883_s3, %s890_s15 }
  0x10   : > { %s281_s28 = scalar_lea.vmem %s880_s0, %s688_s25  ;;  %711 = vmatpush3.bf16.msra.mxu0 %v754_v3  ;;  %s298_s19 = scalar_lea.vmem %s882_s2, %s688_s25 }
  0x11   : > { %712 = vmatprep.subr.bf16.mxu0 %v785_v1  ;;  %v760_v9 = vld [vmem:[%s281_s28] sm:$0xff]   ;;  %s317_s25 = scalar_lea.vmem %s884_s4, %s890_s15 }
  0x14   : > { %713 = vmatpush3.bf16.msra.mxu0 %v755_v4 }
  0x15   : > { %714 = vmatprep.subr.bf16.mxu0 %v785_v1 }
  0x18   : > { %715 = vmatpush3.bf16.msra.mxu0 %v756_v5 }
  0x19   : > { %716 = vmatprep.subr.bf16.mxu0 %v785_v1 }
  0x1c   : > { %717 = vmatpush3.bf16.msra.mxu0 %v757_v6 }
  0x1d   : > { %718 = vmatprep.subr.bf16.mxu0 %v785_v1 }
  0x20   : > { %719 = vmatpush3.bf16.msra.mxu0 %v758_v7 }
  0x21   : > { %720 = vmatprep.subr.bf16.mxu0 %v785_v1 }
  0x24   : > { %721 = vmatpush3.bf16.msra.mxu0 %v759_v8 }
  0x27   : > { %723 = vmatmul.mubr.bf16.vlgmr.msra.gmra.mrb[0].mxu0 %v760_v9 }
  0xfa   : > { %v425_v10 = vpop.f32.mrb[0].mxu0 }
  0xfb   : > { %v724_v11 = vpop.f32.mrb[1].mxu0  ;;  %v450_v13 = vmul.f32 %v425_v10, %v425_v10 }
  0xfc   : > { %v428_v12 = vpop.f32.mrb[2].mxu0 }
  0xfd   : > { %v695_v14 = vpack.c.bf16 %v428_v12, %v425_v10  ;;  %v442_v15 = vadd.f32 %v428_v12, %v425_v10  ;;  %v451_v16 = vmul.f32 %v428_v12, %v428_v12  ;;  %v725_v17 = vpop.f32.mrb[3].mxu0 }
  0xff   : > { %696 = vst [vmem:[%s298_s19] sm:$0xff] %v695_v14   ;;  %v443_v18 = vrot.slane %v442_v15, 4  ;;  %v452_v19 = vadd.f32 %v451_v16, %v450_v13 }
 0x101   : > { %v444_v20 = vadd.f32 %v443_v18, %v442_v15  ;;  %v453_v21 = vrot.slane %v452_v19, 4 }
 0x103   : > { %v445_v22 = vrot.slane %v444_v20, 2  ;;  %v454_v23 = vadd.f32 %v453_v21, %v452_v19 }
 0x105   : > { %v446_v24 = vadd.f32 %v445_v22, %v444_v20  ;;  %v455_v25 = vrot.slane %v454_v23, 2 }
 0x107   : > { %v447_v26 = vrot.slane %v446_v24, 1  ;;  %v456_v27 = vadd.f32 %v455_v25, %v454_v23 }
 0x109   : > { %v448_v28 = vadd.f32 %v447_v26, %v446_v24  ;;  %v457_v29 = vrot.slane %v456_v27, 1 }
 0x10b   : > { %449 = vst [vmem:[%s308_s22] sm:$0x1] %v448_v28  ;;  %v458_v30 = vadd.f32 %v457_v29, %v456_v27 }
 0x10d   : > { %459 = vst [vmem:[%s317_s25] sm:$0x1] %v458_v30 }
 0x10e PF: > { %s15_s17 = sadd.s32 1, %s783_s17   ;;  %s885_s15 = smov %s779_s16 }
 0x10f   : > { %p12_p5 = scmp.ge.s32.totalorder %s15_s17, 4   ;;  %s886_s16 = smov %s888_s18 }
 0x111   :  { %14 = sbr.rel (!%p12_p5) target bundleno = 2 (0x2), region = 85 }

</bundles_post_ra>
